<compile_context>
chip_gen: v7x
topology: tpu7x:2x2x1
jax: 0.10.0
libtpu: 0.0.40
codegen_flags: <defaults>
</compile_context>

<pallas_src>
import jax
import jax.numpy as jnp
from jax.experimental import pallas as pl
from jax.experimental.pallas import tpu as pltpu

EPS = 1e-5


def _vmem_capacity_bytes():
    """Physical VMEM of the current TPU generation (conservative fallback)."""
    try:
        return int(pltpu.get_tpu_info().vmem_capacity_bytes)
    except Exception:
        return 64 * 1024 * 1024  # v7x floor — safe everywhere


def _pick_block_rows(batch, row_bytes, tile_budget):
    """Rows (batch elements) per grid step.

    Respects the (8,128) block rule: the row count is either the full batch
    (always legal) or a multiple of 8 (ragged tail handled by pl.cdiv +
    masked stores, correct because every row normalizes independently).
    """
    if batch <= 8:
        return batch                           # full-extent block
    # Largest multiple-of-8 row count whose f32 tile fits the budget.
    max_tb = max(8, ((tile_budget // max(row_bytes, 1)) // 8) * 8)
    # Keep >= 2 grid steps so a "parallel" axis feeds both v7x TensorCores.
    half = max(8, (((batch + 1) // 2) // 8) * 8)
    return min(max_tb, half)


def _encoder_layer_kernel(x_ref, w_ref, b_ref, o_ref):
    """One grid step == TB batch rows, each row = one flattened (L*D) slab.

    x_ref: (TB, LD)  input tile
    w_ref: (1, LD)   LayerNorm weight (constant index_map -> resident)
    b_ref: (1, LD)   LayerNorm bias
    o_ref: (TB, LD)  output tile
    """
    x = x_ref[...].astype(jnp.float32)            # (TB, LD)
    t = jnp.tanh(x)                               # elementwise tanh (EUP)

    n = t.shape[-1]
    inv_n = jnp.float32(1.0 / n)

    # Single-pass per-row reduction: sum and sum of squares.
    s = jnp.sum(t, axis=-1, keepdims=True)        # (TB, 1)
    ss = jnp.sum(t * t, axis=-1, keepdims=True)   # (TB, 1)
    mean = s * inv_n
    var = jnp.maximum(ss * inv_n - mean * mean, 0.0)   # clamp: fp roundoff
    inv_std = jax.lax.rsqrt(var + EPS)            # (TB, 1)

    w = w_ref[...].astype(jnp.float32)            # (1, LD)
    b = b_ref[...].astype(jnp.float32)            # (1, LD)

    # Fully fused normalize + affine; no full-tile scale/shift temporaries.
    o_ref[...] = (((t - mean) * inv_std) * w + b).astype(o_ref.dtype)


def encoder_layer_forward(x, ln_weight, ln_bias):
    """x: (B, L, D). Returns LayerNorm_{(L,D)}(tanh(x)), matching the module."""
    B, L, D = x.shape
    LD = L * D

    # Lane-dense flatten: per-batch (L, D) slab -> single row of length L*D.
    x2 = x.reshape(B, LD)
    w2 = ln_weight.reshape(1, LD)
    b2 = ln_bias.reshape(1, LD)

    vmem_cap = _vmem_capacity_bytes()
    # ~6-8x the x-tile is live at once (2x in + 2x out double buffers in the
    # I/O dtype plus f32 intermediates), so budget the tile at ~1/10 of VMEM.
    tile_budget = vmem_cap // 10
    vmem_limit = (vmem_cap * 3) // 4

    row_bytes = LD * 4  # f32 working precision inside the kernel
    tb = _pick_block_rows(B, row_bytes, tile_budget)
    grid = (pl.cdiv(B, tb),)

    out2 = pl.pallas_call(
        _encoder_layer_kernel,
        out_shape=jax.ShapeDtypeStruct((B, LD), x.dtype),
        grid=grid,
        in_specs=[
            pl.BlockSpec((tb, LD), lambda i: (i, 0)),
            pl.BlockSpec((1, LD), lambda i: (0, 0)),
            pl.BlockSpec((1, LD), lambda i: (0, 0)),
        ],
        out_specs=pl.BlockSpec((tb, LD), lambda i: (i, 0)),
        compiler_params=pltpu.CompilerParams(
            dimension_semantics=("parallel",),
            vmem_limit_bytes=vmem_limit,
        ),
    )(x2, w2, b2)

    return out2.reshape(B, L, D)


def encoder_layer_reference(x, ln_weight, ln_bias):
    """Pure-JAX reference of the live path of EncoderLayer.forward."""
    t = jnp.tanh(x.astype(jnp.float32))
    mean = jnp.mean(t, axis=(1, 2), keepdims=True)
    var = jnp.mean((t - mean) ** 2, axis=(1, 2), keepdims=True)
    y = (t - mean) / jnp.sqrt(var + EPS)
    return (y * ln_weight[None] + ln_bias[None]).astype(x.dtype)


if __name__ == "__main__":
    # Small shapes consistent with the module: batch=2, length=8, d_model=32.
    B, L, D = 2, 8, 32

    key = jax.random.PRNGKey(0)
    kx, kw, kb = jax.random.split(key, 3)

    x = jax.random.normal(kx, (B, L, D), dtype=jnp.float32)

    # LayerNorm affine params, shape (length, d_model) as in
    # torch.nn.LayerNorm((length, d_model)); perturbed from the default
    # ones/zeros init to exercise the affine path.
    ln_weight = 1.0 + 0.1 * jax.random.normal(kw, (L, D), dtype=jnp.float32)
    ln_bias = 0.1 * jax.random.normal(kb, (L, D), dtype=jnp.float32)

    out = encoder_layer_forward(x, ln_weight, ln_bias)
    out = jax.block_until_ready(out)

    ref = encoder_layer_reference(x, ln_weight, ln_bias)
    assert out.shape == (B, L, D)
    assert jnp.allclose(out, ref, atol=1e-5, rtol=1e-5), (
        f"max abs err = {jnp.max(jnp.abs(out - ref))}"
    )
    print("KERNEL_OK")
</pallas_src>

<mosaic_0001>
module attributes {stable_mosaic.version = 11 : i64} {
  func.func @_encoder_layer_kernel(%arg0: i32, %arg1: memref<2x256xf32, #tpu.memory_space<vmem>>, %arg2: memref<1x256xf32, #tpu.memory_space<vmem>>, %arg3: memref<1x256xf32, #tpu.memory_space<vmem>>, %arg4: memref<2x256xf32, #tpu.memory_space<vmem>>) attributes {dimension_semantics = [#tpu.dimension_semantics<parallel>], iteration_bounds = array<i64: 1>, scalar_prefetch = 0 : i64, scratch_operands = 0 : i64, tpu.core_type = #tpu.core_type<tc>, window_params = [{transform_indices = @transform_0, window_bounds = array<i64: 2, 256>}, {pipeline_mode = #tpu.pipeline_mode<synchronous>, transform_indices = @transform_1, window_bounds = array<i64: 1, 256>}, {pipeline_mode = #tpu.pipeline_mode<synchronous>, transform_indices = @transform_2, window_bounds = array<i64: 1, 256>}, {transform_indices = @transform_3, window_bounds = array<i64: 2, 256>}]} {
    %c0 = arith.constant 0 : index
    %c0_0 = arith.constant 0 : index
    %0 = vector.load %arg1[%c0, %c0_0] : memref<2x256xf32, #tpu.memory_space<vmem>>, vector<2x256xf32>
    %1 = math.tanh %0 : vector<2x256xf32>
    %cst = arith.constant dense<0.000000e+00> : vector<2xf32>
    %2 = vector.multi_reduction <add>, %1, %cst [1] : vector<2x256xf32> to vector<2xf32>
    %3 = vector.shape_cast %2 : vector<2xf32> to vector<2x1xf32>
    %4 = arith.mulf %1, %1 : vector<2x256xf32>
    %cst_1 = arith.constant dense<0.000000e+00> : vector<2xf32>
    %5 = vector.multi_reduction <add>, %4, %cst_1 [1] : vector<2x256xf32> to vector<2xf32>
    %6 = vector.shape_cast %5 : vector<2xf32> to vector<2x1xf32>
    %cst_2 = arith.constant 3.906250e-03 : f32
    %7 = vector.broadcast %cst_2 : f32 to vector<2x1xf32>
    %8 = arith.mulf %3, %7 : vector<2x1xf32>
    %cst_3 = arith.constant 3.906250e-03 : f32
    %9 = vector.broadcast %cst_3 : f32 to vector<2x1xf32>
    %10 = arith.mulf %6, %9 : vector<2x1xf32>
    %11 = arith.mulf %8, %8 : vector<2x1xf32>
    %12 = arith.subf %10, %11 : vector<2x1xf32>
    %cst_4 = arith.constant 0.000000e+00 : f32
    %13 = vector.broadcast %cst_4 : f32 to vector<2x1xf32>
    %14 = arith.maximumf %12, %13 : vector<2x1xf32>
    %cst_5 = arith.constant 9.99999974E-6 : f32
    %15 = vector.broadcast %cst_5 : f32 to vector<2x1xf32>
    %16 = arith.addf %14, %15 : vector<2x1xf32>
    %17 = math.rsqrt %16 : vector<2x1xf32>
    %c0_6 = arith.constant 0 : index
    %c0_7 = arith.constant 0 : index
    %18 = vector.load %arg2[%c0_6, %c0_7] : memref<1x256xf32, #tpu.memory_space<vmem>>, vector<1x256xf32>
    %c0_8 = arith.constant 0 : index
    %c0_9 = arith.constant 0 : index
    %19 = vector.load %arg3[%c0_8, %c0_9] : memref<1x256xf32, #tpu.memory_space<vmem>>, vector<1x256xf32>
    %20 = vector.broadcast %8 : vector<2x1xf32> to vector<2x256xf32>
    %21 = arith.subf %1, %20 : vector<2x256xf32>
    %22 = vector.broadcast %17 : vector<2x1xf32> to vector<2x256xf32>
    %23 = arith.mulf %21, %22 : vector<2x256xf32>
    %24 = vector.broadcast %18 : vector<1x256xf32> to vector<2x256xf32>
    %25 = arith.mulf %23, %24 : vector<2x256xf32>
    %26 = vector.broadcast %19 : vector<1x256xf32> to vector<2x256xf32>
    %27 = arith.addf %25, %26 : vector<2x256xf32>
    %c0_10 = arith.constant 0 : index
    %c0_11 = arith.constant 0 : index
    %28 = vector.load %arg4[%c0_10, %c0_11] : memref<2x256xf32, #tpu.memory_space<vmem>>, vector<2x256xf32>
    tpu.vector_store %arg4[%c0_10, %c0_11], %27 {strides = array<i32>} : memref<2x256xf32, #tpu.memory_space<vmem>>, vector<2x256xf32>,
    return
  }
  func.func @transform_0(%arg0: i32) -> (i32, i32) {
    %c0_i32 = arith.constant 0 : i32
    %c0_i32_0 = arith.constant 0 : i32
    return %arg0, %c0_i32 : i32, i32
  }
  func.func @transform_1(%arg0: i32) -> (i32, i32) {
    %c0_i32 = arith.constant 0 : i32
    %c0_i32_0 = arith.constant 0 : i32
    %c0_i32_1 = arith.constant 0 : i32
    return %c0_i32, %c0_i32_0 : i32, i32
  }
  func.func @transform_2(%arg0: i32) -> (i32, i32) {
    %c0_i32 = arith.constant 0 : i32
    %c0_i32_0 = arith.constant 0 : i32
    %c0_i32_1 = arith.constant 0 : i32
    return %c0_i32, %c0_i32_0 : i32, i32
  }
  func.func @transform_3(%arg0: i32) -> (i32, i32) {
    %c0_i32 = arith.constant 0 : i32
    %c0_i32_0 = arith.constant 0 : i32
    return %arg0, %c0_i32 : i32, i32
  }
}

</mosaic_0001>

<bundles_post_ra>
// kernel: tpu_custom_call.1
= control target key start
LH: loop header
LB: loop body
LE: loop exit
PB: predicated region body
PF: predicated region fallthrough
CT: control target
= control target key end

     0   :  { %8 = vsyncpa [#allocation3], 0  ;;  %s256_s0 = inlined_call_operand.hbm [shape: f32[2,256], index: 0, kind: input, shape index: {}]   ;;  %s257_s1 = inlined_call_operand.vmem [shape: f32[1,256], index: 1, kind: input, shape index: {}]   ;;  %s258_s2 = inlined_call_operand.vmem [shape: f32[1,256], index: 2, kind: input, shape index: {}]   ;;  %s259_s3 = inlined_call_operand.hbm [shape: f32[2,256], index: 3, kind: output, shape index: {}]  }
   0x1   :  { %9 = vsyncpa [#allocation4], 0  ;;  %s202_s12 = smov [#allocation2]   ;;  %s154_s16 = scalar_lea.hbm %s256_s0, 64 }
   0x2   :  { %s16_s13 = sshll.u32 %s202_s12, 4  ;;  %p155_p0 = scmp.ne.s32.totalorder %s256_s0, %s154_s16  ;;  %s17_s13 = int_to_ptr.vmem [resolvable:$true] %s16_s13 }
   0x3   :  { %p158_p1 = scmp.lt.u32.totalorder %s154_s16, %s256_s0 }
   0x5   :  { %p160_p2 = pnand %p158_p1, %p155_p0 }
   0x7   :  { %163 = shalt.err (!%p160_p2)
}
   0x8   :  { %s164_s21 = scalar_lea.vmem %s17_s13, 64  ;;  %p169_p4 = scmp.lt.s32.totalorder %s17_s13, %s17_s13 }
   0x9   :  { %p165_p3 = scmp.ne.s32.totalorder %s17_s13, %s164_s21  ;;  %p170_p5 = scmp.lt.s32.totalorder %s164_s21, %s164_s21 }
   0xb   :  { %p171_p6 = por %p170_p5, %p169_p4 }
   0xd   :  { %p172_p7 = pnand %p171_p6, %p165_p3 }
   0xf   :  { %175 = shalt.err (!%p172_p7)
}
  0x10   :  { %19 = dma.hbm_to_vmem [thread:$0]  %s256_s0, 64, %s17_s13, [#allocation3]  }
  0x11   :  { %198 = dma.done.wait [#allocation3], 64  }
  0x12   :  { %199 = vsyncadd [#allocation3], 4294967232  ;;  %v27_v0 = vld [vmem:[#allocation2] sm:$0xf]  ;;  %v203_v1 = vmov 1983009808   ;;  %v33_v3 = vlaneseq }
  0x13   :  { %v31_v2 = vunpack.c.l.s4 %v203_v1  ;;  %150 = vtanh.f32 %v27_v0  ;;  %vm40_vm0 = vcmask 1041408   ;;  %v70_v19 = vld [vmem:[%s257_s1] sm:$0x3]  ;;  %v204_v37 = vmov 269488144   ;;  %s205_s1 = smov [#allocation5]  }
  0x14   :  { %v34_v5 = vshrl.u32 %v33_v3, 7  ;;  %v71_v22 = vld [vmem:[%s258_s2] sm:$0x3]  ;;  %v74_v38 = vunpack.c.l.s4 %v204_v37  ;;  %s137_s2 = sshll.u32 %s205_s1, 4  ;;  %s138_s2 = int_to_ptr.vmem [resolvable:$true] %s137_s2 }
  0x15   :  { %v32_v4 = vunpack.c.0.s8 %v31_v2  ;;  %s176_s27 = scalar_lea.vmem %s138_s2, 64  ;;  %p181_p9 = scmp.lt.s32.totalorder %s138_s2, %s138_s2 }
  0x16   :  { %v95_v20 = vsub.s32 0, %v34_v5  ;;  %v99_v21 = vsub.s32 1, %v34_v5  ;;  %v75_v41 = vunpack.c.0.s8 %v74_v38  ;;  %p177_p8 = scmp.ne.s32.totalorder %s138_s2, %s176_s27  ;;  %p182_p10 = scmp.lt.s32.totalorder %s176_s27, %s176_s27 }
  0x17   :  { %v35_v6 = vsub.s32 %v32_v4, %v34_v5 }
  0x18   :  { %v96_v23 = vrot.slane %v70_v19, %v95_v20  ;;  %v100_v24 = vrot.slane %v70_v19, %v99_v21  ;;  %v115_v26 = vrot.slane %v71_v22, %v95_v20  ;;  %v119_v27 = vrot.slane %v71_v22, %v99_v21  ;;  %p183_p11 = por %p182_p10, %p181_p9 }
  0x19   :  { %v78_v42 = vsub.s32 %v75_v41, %v34_v5 }
  0x1a   :  { %v101_v25 = vcombine.low %v96_v23, %v100_v24  ;;  %v120_v29 = vcombine.low %v115_v26, %v119_v27  ;;  %p184_p12 = pnand %p183_p11, %p177_p8 }
  0x1c   :  { %v108_v28 = vrot.slane %v101_v25, %v35_v6  ;;  %v127_v30 = vrot.slane %v120_v29, %v35_v6 }
  0x1d   :  { %v151_v7 = vpop.eup %150 }
  0x1e   :  { %v36_v8 = vrot.slane %v151_v7, %v35_v6  ;;  %v46_v9 = vmul.f32 %v151_v7, %v151_v7 }
  0x20   :  { %v37_v10 = vcombine.high %v36_v8, %v36_v8  ;;  %v41_v11 = vsel %vm40_vm0, %v36_v8, 0.0  ;;  %v54_v12 = vrot.slane %v46_v9, %v35_v6 }
  0x22   :  { %v42_v13 = vsel %vm40_vm0, %v37_v10, 0.0  ;;  %v55_v14 = vcombine.high %v54_v12, %v54_v12  ;;  %v58_v15 = vsel %vm40_vm0, %v54_v12, 0.0 }
  0x23   :  { %v43_v16 = vadd.f32 %v42_v13, %v41_v11 }
  0x24   :  { %v59_v17 = vsel %vm40_vm0, %v55_v14, 0.0 }
  0x25   :  { %44 = vadd.xlane.f32.xlu0 %v43_v16  ;;  %v60_v18 = vadd.f32 %v59_v17, %v58_v15 }
  0x29   :  { %61 = vadd.xlane.f32.xlu0 %v60_v18 }
  0xb2   :  { %v45_v31 = vpop.xlane.xlu0 %44 }
  0xb3   :  { %v63_v32 = vmul.f32 0.00390625, %v45_v31 }
  0xb5   :  { %v65_v34 = vmul.f32 %v63_v32, %v63_v32  ;;  %v79_v43 = vrot.slane %v63_v32, %v78_v42 }
  0xb6   :  { %v62_v33 = vpop.xlane.xlu0 %61 }
  0xb7   :  { %v64_v35 = vmul.f32 0.00390625, %v62_v33  ;;  %v81_v45 = vsub.f32 %v151_v7, %v79_v43 }
  0xb9   :  { %v66_v36 = vsub.f32 %v64_v35, %v65_v34 }
  0xbb   :  { %v67_v39 = vmax.f32 %v66_v36, 0.0 }
  0xbd   :  { %v68_v40 = vadd.f32 1e-05, %v67_v39 }
  0xbf   :  { %152 = vrsqrt.f32 %v68_v40 }
  0xc9   :  { %v153_v44 = vpop.eup %152 }
  0xca   :  { %v89_v46 = vrot.slane %v153_v44, %v78_v42 }
  0xcc   :  { %v91_v47 = vmul.f32 %v89_v46, %v81_v45 }
  0xce   :  { %v110_v48 = vmul.f32 %v108_v28, %v91_v47 }
  0xd0   :  { %v129_v49 = vadd.f32 %v127_v30, %v110_v48 }
  0xd2   :  { %130 = vst [vmem:[#allocation5] sm:$0xf] %v129_v49 }
  0xd3   :  { %187 = shalt.err (!%p184_p12)
}
  0xd4   :  { %s188_s30 = scalar_lea.hbm %s259_s3, 64 }
  0xd5   :  { %p189_p13 = scmp.ne.s32.totalorder %s259_s3, %s188_s30  ;;  %p192_p0 = scmp.lt.u32.totalorder %s188_s30, %s259_s3 }
  0xd7   :  { %p194_p1 = pnand %p192_p0, %p189_p13 }
  0xd9   :  { %197 = shalt.err (!%p194_p1)
}
  0xda   :  { %140 = dma.vmem_to_hbm [thread:$0]  %s138_s2, 64, %s259_s3, [#allocation4]  }
  0xdb   :  { %200 = dma.done.wait [#allocation4], 64  }
  0xdc   :  { %201 = vsyncadd [#allocation4], 4294967232 }
  0xdd   :  { %144 = vsyncpa [#allocation3], 1 }
  0xde   :  { %145 = vsyncpa [#allocation4], 1 }

</bundles_post_ra>
